<compile_context>
chip_gen: v7x
topology: tpu7x:2x2x1
jax: 0.10.0
libtpu: 0.0.40
codegen_flags: <defaults>
</compile_context>

<pallas_src>
import functools

import jax
import jax.numpy as jnp
from jax import lax
from jax.experimental import pallas as pl
from jax.experimental.pallas import tpu as pltpu


# ---------------------------------------------------------------------------
# Generation-aware VMEM budgets
# ---------------------------------------------------------------------------
def _vmem_budgets():
    """Return (vmem_limit_bytes, ln_tile_budget_bytes) for this chip."""
    cap = 64 << 20  # conservative default (v7x: 64 MiB physical per TC)
    try:
        info = pltpu.get_tpu_info()
        cap = int(getattr(info, "vmem_capacity_bytes", cap))
    except Exception:
        pass
    if cap >= (128 << 20):            # v5e / v6e: 128 MiB physical VMEM
        return 96 << 20, 56 << 20
    return 48 << 20, 24 << 20         # v7x: stay well inside 64 MiB


# ---------------------------------------------------------------------------
# Stats path:  stats = SiLU(z) [@ W_lora^T] @ W_proj^T + b   (batched over B)
# ---------------------------------------------------------------------------
def _stats_kernel(z_ref, w_ref, b_ref, s_ref):
    # z_ref: (B, D)  w_ref: (TS, D) rows of proj weight  b_ref: (1, TS)
    # s_ref: (B, TS)
    z = z_ref[...].astype(jnp.float32)
    a = (z * jax.nn.sigmoid(z)).astype(w_ref.dtype)            # SiLU f32, MXU in weight dtype
    stats = lax.dot_general(a, w_ref[...], (((1,), (1,)), ((), ())),
                            preferred_element_type=jnp.float32)  # contract "in" dim, no transpose
    s_ref[...] = (stats + b_ref[...].astype(jnp.float32)).astype(s_ref.dtype)


def _stats_lora_kernel(z_ref, wl_ref, wp_ref, b_ref, s_ref, h_ref):
    # z_ref: (B, D)  wl_ref: (R, D)  wp_ref: (TS, R)  b_ref: (1, TS)
    # s_ref: (B, TS)  h_ref: (B, R) f32 scratch, persists across the S grid
    @pl.when(pl.program_id(0) == 0)
    def _():
        z = z_ref[...].astype(jnp.float32)
        a = (z * jax.nn.sigmoid(z)).astype(wl_ref.dtype)
        h_ref[...] = lax.dot_general(a, wl_ref[...], (((1,), (1,)), ((), ())),
                                     preferred_element_type=jnp.float32)   # (B, R)
    h = h_ref[...].astype(wp_ref.dtype)
    stats = lax.dot_general(h, wp_ref[...], (((1,), (1,)), ((), ())),
                            preferred_element_type=jnp.float32)             # (B, TS)
    s_ref[...] = (stats + b_ref[...].astype(jnp.float32)).astype(s_ref.dtype)


# ---------------------------------------------------------------------------
# LayerNorm + modulation:  out = LN(x) * (1 + scale) + shift
# ---------------------------------------------------------------------------
def _ln_mod_kernel(x_ref, stats_ref, o_ref, *, eps, low_precision_mod):
    # x_ref: (1, TN, D)  stats_ref: (1, num_stats, D)  o_ref: (1, TN, D)
    x = x_ref[0].astype(jnp.float32)                            # (TN, D)
    if eps:
        inv_d = 1.0 / x.shape[-1]
        mean = jnp.sum(x, axis=-1, keepdims=True) * inv_d       # two-pass variance:
        xc = x - mean                                           # no E[x^2]-E[x]^2 cancellation
        var = jnp.sum(xc * xc, axis=-1, keepdims=True) * inv_d
        xn = xc * lax.rsqrt(var + eps)
    else:
        xn = x                                                  # norm = Identity when eps is falsy
    st = stats_ref[0]                                           # (num_stats, D)
    scale, shift = st[0], st[1]                                 # (D,), broadcast over TN
    if low_precision_mod:
        # bf16/fp16 VALU packs 2 elem/lane on v6e/v7x; matches torch low-precision math.
        one = jnp.ones((), dtype=o_ref.dtype)
        o_ref[0] = (xn.astype(o_ref.dtype) * (one + scale.astype(o_ref.dtype))
                    + shift.astype(o_ref.dtype))
    else:
        o_ref[0] = (xn * (1.0 + scale.astype(jnp.float32))
                    + shift.astype(jnp.float32)).astype(o_ref.dtype)


# ---------------------------------------------------------------------------
# Tiling helpers
# ---------------------------------------------------------------------------
def _pick_tn(N, D, in_dtype, out_dtype, tile_budget):
    """N-tile: double-buffered in/out tiles + ~16 B/elem of live f32 temps."""
    in_b = jnp.dtype(in_dtype).itemsize
    out_b = jnp.dtype(out_dtype).itemsize
    per_row = D * (2 * in_b + 2 * out_b + 16)
    tn = tile_budget // max(per_row, 1)
    tn = max(8, min(tn, 4096))
    if tn >= N:
        return N                              # full axis: no divisibility constraint
    return max(8, (tn // 8) * 8)              # second-to-last dim must be %8


def _pick_ts(S, K, w_itemsize, vmem_limit):
    """Proj-output tile along S: (TS, K) weight tile must multi-buffer inside
    the VMEM limit; prefer a TS that divides S exactly (no padded last tile)."""
    cap_bytes = vmem_limit // 3               # room for >=2-3 weight buffers + rest
    cap = max(128, cap_bytes // max(K * w_itemsize, 1))
    if S <= cap:
        return S                              # full axis: no padding, no constraint
    ts = (min(cap, S) // 128) * 128
    while ts >= 128 and S % ts != 0:
        ts -= 128                             # largest multiple of 128 dividing S
    if ts < 128:
        ts = max(128, (min(cap, S) // 128) * 128)   # fallback: padded boundary tile
    return ts


# ---------------------------------------------------------------------------
# Public entry point
# ---------------------------------------------------------------------------
def ada_layer_norm_zero(x, z, params, *, num_stats=2, eps=1e-6):
    """Pallas implementation of AdaLayerNormZero.forward.

    x: (B, N, D), z: (B, 1, D).
    Returns (modulated_x, tuple_of_extra_stats) — empty tuple when num_stats == 2.
    """
    B, N, D = x.shape
    assert z.shape == (B, 1, D)
    w_proj = params["proj_weight"]          # (num_stats*D, D) or (num_stats*D, R)
    b_proj = params["proj_bias"]            # (num_stats*D,)
    w_lora = params.get("lora_weight")      # (R, D) or None
    S = num_stats * D
    vmem_limit, ln_tile_budget = _vmem_budgets()
    stats_dtype = jnp.result_type(z.dtype, w_proj.dtype)   # keep stats in compute dtype

    z2 = z.reshape(B, D)
    bp = b_proj.reshape(1, S)

    # ---- 1) stats = proj(lora(SiLU(z))) + b, batched over B, tiled over S ----
    K = w_proj.shape[1]                     # D (no lora) or R (lora)
    TS = _pick_ts(S, K, jnp.dtype(w_proj.dtype).itemsize, vmem_limit)
    n_s = pl.cdiv(S, TS)

    # Deeper buffering on the weight stream when the S grid is long enough for
    # DMA issue/turnaround latency to be exposed (this pass is weight-DMA bound).
    if n_s >= 3 and hasattr(pl, "Buffered"):
        w_spec = pl.BlockSpec((TS, K), lambda s: (s, 0), pipeline_mode=pl.Buffered(3))
    else:
        w_spec = pl.BlockSpec((TS, K), lambda s: (s, 0))

    if w_lora is None:
        stats = pl.pallas_call(
            _stats_kernel,
            out_shape=jax.ShapeDtypeStruct((B, S), stats_dtype),
            grid_spec=pltpu.PrefetchScalarGridSpec(
                num_scalar_prefetch=0,
                grid=(n_s,),
                in_specs=[pl.BlockSpec((B, D), lambda s: (0, 0)),
                          w_spec,
                          pl.BlockSpec((1, TS), lambda s: (0, s))],
                out_specs=pl.BlockSpec((B, TS), lambda s: (0, s))),
            compiler_params=pltpu.CompilerParams(
                dimension_semantics=("parallel",),
                vmem_limit_bytes=vmem_limit),
        )(z2, w_proj, bp)
    else:
        R = w_lora.shape[0]
        stats = pl.pallas_call(
            _stats_lora_kernel,
            out_shape=jax.ShapeDtypeStruct((B, S), stats_dtype),
            grid_spec=pltpu.PrefetchScalarGridSpec(
                num_scalar_prefetch=0,
                grid=(n_s,),
                in_specs=[pl.BlockSpec((B, D), lambda s: (0, 0)),
                          pl.BlockSpec((R, D), lambda s: (0, 0)),
                          w_spec,
                          pl.BlockSpec((1, TS), lambda s: (0, s))],
                out_specs=pl.BlockSpec((B, TS), lambda s: (0, s)),
                scratch_shapes=[pltpu.VMEM((B, R), jnp.float32)]),
            compiler_params=pltpu.CompilerParams(
                # "arbitrary": the s==0 hoist of h must run before later S tiles
                dimension_semantics=("arbitrary",),
                vmem_limit_bytes=vmem_limit),
        )(z2, w_lora, w_proj, bp)

    # Contiguous reshape: metadata only, no HBM round-trip.  The LN kernel picks
    # scale/shift out of this block itself (no wrapper-side (B,D) slice copies).
    stats3 = stats.reshape(B, num_stats, D)

    # ---- 2) LayerNorm + modulation, tiled over (B, N) ----
    TN = _pick_tn(N, D, x.dtype, x.dtype, ln_tile_budget)
    low_precision_mod = jnp.dtype(x.dtype).itemsize < 4
    # TODO(synk): on v7x, verify in the profile that the (B, N) grid shards across
    # both TensorCores; if one TC idles, switch the N axis to pltpu.CORE_PARALLEL.
    out = pl.pallas_call(
        functools.partial(_ln_mod_kernel, eps=eps,
                          low_precision_mod=low_precision_mod),
        out_shape=jax.ShapeDtypeStruct((B, N, D), x.dtype),
        grid_spec=pltpu.PrefetchScalarGridSpec(
            num_scalar_prefetch=0,
            grid=(B, pl.cdiv(N, TN)),
            in_specs=[pl.BlockSpec((1, TN, D), lambda b, n: (b, n, 0)),
                      pl.BlockSpec((1, num_stats, D), lambda b, n: (b, 0, 0))],
            out_specs=pl.BlockSpec((1, TN, D), lambda b, n: (b, n, 0))),
        compiler_params=pltpu.CompilerParams(
            dimension_semantics=("parallel", "parallel"),
            vmem_limit_bytes=vmem_limit),
    )(x, stats3)

    extras = tuple(stats3[:, i:i + 1, :] for i in range(2, num_stats))
    return out, extras


# ---------------------------------------------------------------------------
# Pure-JAX reference (mirrors the PyTorch module) + self-test
# ---------------------------------------------------------------------------
def _ref_forward(x, z, params, num_stats=2, eps=1e-6):
    h = jax.nn.silu(z)
    if params.get("lora_weight") is not None:
        h = h @ params["lora_weight"].T
    stats_full = h @ params["proj_weight"].T + params["proj_bias"]
    chunks = jnp.split(stats_full, num_stats, axis=-1)
    if eps:
        mean = jnp.mean(x, axis=-1, keepdims=True)
        var = jnp.mean(jnp.square(x - mean), axis=-1, keepdims=True)
        xn = (x - mean) / jnp.sqrt(var + eps)
    else:
        xn = x
    return xn * (1.0 + chunks[0]) + chunks[1], tuple(chunks[2:])


if __name__ == "__main__":
    key = jax.random.PRNGKey(0)
    B, N, D = 2, 8, 32
    kx, kz, kw, kb, kl, kw2, kw3, kb3 = jax.random.split(key, 8)

    x = jax.random.normal(kx, (B, N, D), dtype=jnp.float32)
    z = jax.random.normal(kz, (B, 1, D), dtype=jnp.float32)

    # --- rank=None, num_stats=2 (lora = Identity), module defaults ---
    ns = 2
    params = {
        "proj_weight": 0.02 * jax.random.normal(kw, (ns * D, D), jnp.float32),
        "proj_bias": 0.02 * jax.random.normal(kb, (ns * D,), jnp.float32),
        "lora_weight": None,
    }
    out, extra = ada_layer_norm_zero(x, z, params, num_stats=ns)
    out = jax.block_until_ready(out)
    ref_out, _ = _ref_forward(x, z, params, num_stats=ns)
    assert out.shape == (B, N, D) and extra == ()
    assert jnp.allclose(out, ref_out, atol=2e-5, rtol=2e-5)

    # --- rank=16, num_stats=2 (low-rank lora before proj) ---
    R = 16
    params_lora = {
        "lora_weight": 0.05 * jax.random.normal(kl, (R, D), jnp.float32),
        "proj_weight": 0.02 * jax.random.normal(kw2, (ns * D, R), jnp.float32),
        "proj_bias": 0.02 * jax.random.normal(kb, (ns * D,), jnp.float32),
    }
    out2, extra2 = ada_layer_norm_zero(x, z, params_lora, num_stats=ns)
    out2 = jax.block_until_ready(out2)
    ref_out2, _ = _ref_forward(x, z, params_lora, num_stats=ns)
    assert extra2 == ()
    assert jnp.allclose(out2, ref_out2, atol=2e-5, rtol=2e-5)

    # --- rank=None, num_stats=3 (extra gate stat returned) ---
    ns3 = 3
    params3 = {
        "proj_weight": 0.02 * jax.random.normal(kw3, (ns3 * D, D), jnp.float32),
        "proj_bias": 0.02 * jax.random.normal(kb3, (ns3 * D,), jnp.float32),
        "lora_weight": None,
    }
    out3, extra3 = ada_layer_norm_zero(x, z, params3, num_stats=ns3)
    out3 = jax.block_until_ready(out3)
    ref_out3, ref_extra3 = _ref_forward(x, z, params3, num_stats=ns3)
    assert len(extra3) == 1 and extra3[0].shape == (B, 1, D)
    assert jnp.allclose(out3, ref_out3, atol=2e-5, rtol=2e-5)
    assert jnp.allclose(extra3[0], ref_extra3[0], atol=2e-5, rtol=2e-5)

    print("KERNEL_OK")
</pallas_src>

<mosaic_0001>
module attributes {stable_mosaic.version = 11 : i64} {
  func.func @_stats_kernel(%arg0: i32, %arg1: memref<2x32xf32, #tpu.memory_space<vmem>>, %arg2: memref<64x32xf32, #tpu.memory_space<vmem>>, %arg3: memref<1x64xf32, #tpu.memory_space<vmem>>, %arg4: memref<2x64xf32, #tpu.memory_space<vmem>>) attributes {dimension_semantics = [#tpu.dimension_semantics<parallel>], iteration_bounds = array<i64: 1>, scalar_prefetch = 0 : i64, scratch_operands = 0 : i64, tpu.core_type = #tpu.core_type<tc>, window_params = [{pipeline_mode = #tpu.pipeline_mode<synchronous>, transform_indices = @transform_0, window_bounds = array<i64: 2, 32>}, {transform_indices = @transform_1, window_bounds = array<i64: 64, 32>}, {transform_indices = @transform_2, window_bounds = array<i64: 1, 64>}, {transform_indices = @transform_3, window_bounds = array<i64: 2, 64>}]} {
    %c0 = arith.constant 0 : index
    %c0_0 = arith.constant 0 : index
    %0 = vector.load %arg1[%c0, %c0_0] : memref<2x32xf32, #tpu.memory_space<vmem>>, vector<2x32xf32>
    %1 = arith.negf %0 : vector<2x32xf32>
    %2 = math.exp %1 : vector<2x32xf32>
    %cst = arith.constant 1.000000e+00 : f32
    %3 = vector.broadcast %cst : f32 to vector<2x32xf32>
    %4 = arith.addf %3, %2 : vector<2x32xf32>
    %5 = arith.divf %3, %4 : vector<2x32xf32>
    %6 = arith.mulf %0, %5 : vector<2x32xf32>
    %c0_1 = arith.constant 0 : index
    %c0_2 = arith.constant 0 : index
    %7 = vector.load %arg2[%c0_1, %c0_2] : memref<64x32xf32, #tpu.memory_space<vmem>>, vector<64x32xf32>
    %cst_3 = arith.constant dense<0.000000e+00> : vector<2x64xf32>
    %8 = tpu.matmul %6, %7, %cst_3 {dimension_numbers = #tpu.dot_dimension_numbers<[1], [1], [0], [0], [0, 0, 1, 0], [], []>} : vector<2x32xf32>, vector<64x32xf32>, vector<2x64xf32> -> vector<2x64xf32>
    %c0_4 = arith.constant 0 : index
    %c0_5 = arith.constant 0 : index
    %9 = vector.load %arg3[%c0_4, %c0_5] : memref<1x64xf32, #tpu.memory_space<vmem>>, vector<1x64xf32>
    %10 = vector.broadcast %9 : vector<1x64xf32> to vector<2x64xf32>
    %11 = arith.addf %8, %10 : vector<2x64xf32>
    %c0_6 = arith.constant 0 : index
    %c0_7 = arith.constant 0 : index
    %12 = vector.load %arg4[%c0_6, %c0_7] : memref<2x64xf32, #tpu.memory_space<vmem>>, vector<2x64xf32>
    tpu.vector_store %arg4[%c0_6, %c0_7], %11 {strides = array<i32>} : memref<2x64xf32, #tpu.memory_space<vmem>>, vector<2x64xf32>,
    return
  }
  func.func @transform_0(%arg0: i32) -> (i32, i32) {
    %c0_i32 = arith.constant 0 : i32
    %c0_i32_0 = arith.constant 0 : i32
    %c0_i32_1 = arith.constant 0 : i32
    return %c0_i32, %c0_i32_0 : i32, i32
  }
  func.func @transform_1(%arg0: i32) -> (i32, i32) {
    %c0_i32 = arith.constant 0 : i32
    %c0_i32_0 = arith.constant 0 : i32
    return %arg0, %c0_i32 : i32, i32
  }
  func.func @transform_2(%arg0: i32) -> (i32, i32) {
    %c0_i32 = arith.constant 0 : i32
    %c0_i32_0 = arith.constant 0 : i32
    return %c0_i32, %arg0 : i32, i32
  }
  func.func @transform_3(%arg0: i32) -> (i32, i32) {
    %c0_i32 = arith.constant 0 : i32
    %c0_i32_0 = arith.constant 0 : i32
    return %c0_i32, %arg0 : i32, i32
  }
}

</mosaic_0001>

<bundles_post_ra>
// kernel: tpu_custom_call.1
= control target key start
LH: loop header
LB: loop body
LE: loop exit
PB: predicated region body
PF: predicated region fallthrough
CT: control target
= control target key end

     0   :  { %vm38_vm0 = vcmask 261120   ;;  %v239_v2 = vmov 0.0|0.0   ;;  %vm240_vm2 = vmmov 0   ;;  %v241_v5 = vmov 0.0   ;;  %s320_s0 = inlined_call_operand.vmem [shape: f32[2,32], index: 0, kind: input, shape index: {}]   ;;  %s321_s1 = inlined_call_operand.vmem [shape: f32[64,32], index: 1, kind: input, shape index: {}]   ;;  %s322_s2 = inlined_call_operand.vmem [shape: f32[1,64], index: 2, kind: input, shape index: {}]   ;;  %s323_s3 = inlined_call_operand.hbm [shape: f32[2,64], index: 3, kind: output, shape index: {}]  }
   0x1   :  { %v23_v0 = vld [vmem:[%s321_s1] sm:$0xff]  ;;  %v24_v1 = vld [vmem:[%s321_s1 + $0x8] sm:$0xff]  ;;  %191 = vmatprep.subr.bf16.mxu0 %v239_v2  ;;  %vm271_vm1 = vmpackc.low %vm38_vm0, %vm38_vm0  ;;  %188 = vmatprep.mubr.msk.f32.mxu0 %vm240_vm2, %v241_v5 }
   0x2   :  { %v192_v3 = vpack.c.bf16 %v24_v1, %v23_v0  ;;  %v15_v6 = vld [vmem:[%s320_s0] sm:$0x3] }
   0x4   :  { %194 = vmatpush3.bf16.xpose.msk.msra.mxu0 %vm271_vm1, %v192_v3 }
   0x5   :  { %8 = vsyncpa [#allocation3], 0  ;;  %195 = vmatprep.subr.bf16.mxu0 %v239_v2  ;;  %v25_v7 = vld [vmem:[%s321_s1 + $0x10] sm:$0xff]  ;;  %v26_v8 = vld [vmem:[%s321_s1 + $0x18] sm:$0xff]  ;;  %v152_v9 = vmul.f32 -1.442695, %v15_v6 }
   0x6   :  { %v196_v10 = vpack.c.bf16 %v26_v8, %v25_v7  ;;  %v27_v11 = vld [vmem:[%s321_s1 + $0x20] sm:$0xff]  ;;  %v28_v12 = vld [vmem:[%s321_s1 + $0x28] sm:$0xff]  ;;  %v29_v16 = vld [vmem:[%s321_s1 + $0x30] sm:$0xff]  ;;  %s242_s4 = smov [#allocation2]   ;;  %vm136_vm3 = vcmask 517120  }
   0x7   :  { %211 = vpow2.f32 %v152_v9  ;;  %v200_v13 = vpack.c.bf16 %v28_v12, %v27_v11  ;;  %v30_v17 = vld [vmem:[%s321_s1 + $0x38] sm:$0xff]  ;;  %v153_v21 = vld [vmem:[%s322_s2] ss:$0 sm:$0xff]  ;;  %s144_s5 = sshll.u32 %s242_s4, 4  ;;  %s145_s5 = int_to_ptr.vmem [resolvable:$true] %s144_s5 }
   0x8   :  { %v204_v18 = vpack.c.bf16 %v30_v17, %v29_v16  ;;  %s215_s1 = scalar_lea.vmem %s145_s5, 32  ;;  %p220_p1 = scmp.lt.s32.totalorder %s145_s5, %s145_s5 }
   0x9   :  { %p216_p0 = scmp.ne.s32.totalorder %s145_s5, %s215_s1  ;;  %p221_p2 = scmp.lt.s32.totalorder %s215_s1, %s215_s1 }
   0xb   :  { %p222_p3 = por %p221_p2, %p220_p1 }
   0xc   :  { %198 = vmatpush3.bf16.xpose.msk.msra.mxu0 %vm271_vm1, %v196_v10 }
   0xd   :  { %199 = vmatprep.subr.bf16.mxu0 %v239_v2  ;;  %p223_p4 = pnand %p222_p3, %p216_p0 }
  0x11   :  { %v212_v14 = vpop.eup %211 }
  0x12   :  { %v19_v15 = vadd.f32 1.0, %v212_v14 }
  0x14   :  { %202 = vmatpush3.bf16.xpose.msk.msra.mxu0 %vm271_vm1, %v200_v13  ;;  %213 = vrcp.f32 %v19_v15 }
  0x15   :  { %203 = vmatprep.subr.bf16.mxu0 %v239_v2 }
  0x1c   :  { %206 = vmatpush3.bf16.xpose.msk.msra.mxu0 %vm271_vm1, %v204_v18 }
  0x1e   :  { %v214_v19 = vpop.eup %213 }
  0x1f   :  { %v22_v20 = vmul.f32 %v214_v19, %v15_v6 }
  0x23   :  { %189 = vmatmul.mubr.msk.f32.vlgmr.msra.gmra.mrb[0].mxu0 %vm38_vm0, %v22_v20 }
  0xf6   :  { %v132_v22 = vpop.f32.mrb[0].mxu0 }
  0xf7   :  { %v133_v23 = vadd.f32 %v153_v21, %v132_v22  ;;  %v190_v24 = vpop.f32.mrb[1].mxu0 }
  0xf9   :  { %137 = vst.msk [vmem:[#allocation2] sm:$0x3] %vm136_vm3, %v133_v23 }
  0xfa   :  { %226 = shalt.err (!%p223_p4)
}
  0xfb   :  { %s227_s8 = scalar_lea.hbm %s323_s3, 32 }
  0xfc   :  { %p228_p5 = scmp.ne.s32.totalorder %s323_s3, %s227_s8  ;;  %p231_p6 = scmp.lt.u32.totalorder %s227_s8, %s323_s3 }
  0xfe   :  { %p233_p7 = pnand %p231_p6, %p228_p5 }
 0x100   :  { %236 = shalt.err (!%p233_p7)
}
 0x101   :  { %147 = dma.vmem_to_hbm [thread:$0]  %s145_s5, 32, %s323_s3, [#allocation3]  }
 0x102   :  { %237 = dma.done.wait [#allocation3], 32  }
 0x103   :  { %238 = vsyncadd [#allocation3], 4294967264 }
 0x104   :  { %151 = vsyncpa [#allocation3], 1 }

</bundles_post_ra>
